<compile_context>
chip_gen: v6e
topology: v6e:2x2x1
jax: 0.10.0
libtpu: 0.0.40
codegen_flags: <defaults>
</compile_context>

<pallas_src>
import jax
import jax.numpy as jnp
from jax.experimental import pallas as pl
from jax.experimental.pallas import tpu as pltpu


def _round_up(x: int, m: int) -> int:
    return ((x + m - 1) // m) * m


def _make_uv_sample_kernel(C: int, H: int, W: int):
    """Bilinear grid_sample (mode='bilinear', padding_mode='zeros',
    align_corners=False) of a resident channels-first image, separable form."""

    def kernel(img_ref, gxy_ref, out_ref):
        # img_ref: (C*H, W)  tanh'd image in bf16, row index = c*H + h
        # gxy_ref: (2, TN)   row 0 = x (width coord), row 1 = y (height coord)
        # out_ref: (C, TN)   sampled texture, lane-dense point axis
        TN = gxy_ref.shape[1]

        x = gxy_ref[0:1, :]                                   # (1, TN)
        y = gxy_ref[1:2, :]                                   # (1, TN)

        # grid_sample unnormalization, align_corners=False:
        #   pix = ((coord + 1) * size - 1) / 2
        ix = ((x + 1.0) * W - 1.0) * 0.5
        iy = ((y + 1.0) * H - 1.0) * 0.5

        ix0f = jnp.floor(ix)
        iy0f = jnp.floor(iy)
        wx1 = ix - ix0f
        wx0 = 1.0 - wx1
        wy1 = iy - iy0f
        wy0 = 1.0 - wy1

        ix0 = ix0f.astype(jnp.int32)
        iy0 = iy0f.astype(jnp.int32)
        ix1 = ix0 + 1
        iy1 = iy0 + 1

        # zeros padding: out-of-bounds corner weights are zeroed BEFORE they
        # enter a one-hot (ix1==W / iy1==H must never alias a real column/row).
        cwx0 = jnp.where((ix0 >= 0) & (ix0 < W), wx0, 0.0)    # (1, TN)
        cwx1 = jnp.where((ix1 >= 0) & (ix1 < W), wx1, 0.0)
        rwy0 = jnp.where((iy0 >= 0) & (iy0 < H), wy0, 0.0)
        rwy1 = jnp.where((iy1 >= 0) & (iy1 < H), wy1, 0.0)

        # Separable weighted one-hots built from tiny (W,1)/(H,1) sublane
        # iotas broadcast against the (1, TN) indices -- no (H*W, TN)
        # intermediates are ever materialized.
        col_iota = jax.lax.broadcasted_iota(jnp.int32, (W, 1), 0)
        row_iota = jax.lax.broadcasted_iota(jnp.int32, (H, 1), 0)
        col_oh = (jnp.where(col_iota == ix0, cwx0, 0.0)
                  + jnp.where(col_iota == ix1, cwx1, 0.0))    # (W, TN) f32
        row_oh = (jnp.where(row_iota == iy0, rwy0, 0.0)
                  + jnp.where(row_iota == iy1, rwy1, 0.0))    # (H, TN) f32

        # Single fused MXU dot contracts the width axis for every (c, h) row:
        #   tmp[c*H + h, n] = sum_w img[c, h, w] * col_oh[w, n]
        tmp = jnp.dot(img_ref[...], col_oh.astype(jnp.bfloat16),
                      preferred_element_type=jnp.float32)     # (C*H, TN)

        # Height contraction on the VPU with unquantized f32 y-weights:
        #   out[c, n] = sum_h row_oh[h, n] * tmp[c*H + h, n]
        # (H is a multiple of 8 here, so the reshape is a pure vreg regroup.)
        out_ref[...] = jnp.sum(
            tmp.reshape(C, H, TN) * row_oh[None, :, :], axis=1)

    return kernel


@jax.jit
def uv_image_model_forward(weight, uv):
    """Equivalent of UVImageModel.forward().

    weight: (1, 3, S, S) float32 raw parameter (tanh applied here)
    uv    : (f, t, t, 2) float32 normalized coords in [-1, 1]
    returns texture of shape (1, f, t, t, 3) float32
    """
    _, C, H, W = weight.shape
    f, t = uv.shape[0], uv.shape[1]
    N = f * t * t

    # Point tile: lane-dense (>=128) output axis.  TN=256 -> grid=(2,) at the
    # demo size, i.e. one step per TensorCore on v7x and only ~0.7 us of step
    # overhead on single-TC v5e/v6e.
    TN = min(256, _round_up(N, 128))
    N_pad = _round_up(N, TN)

    # ---- once-per-forward prep (fused into the same jit) ----
    # tanh + bf16 cast hoisted out of the per-grid-step kernel body; doing it
    # here keeps the kernel megacore-safe with "parallel" grid semantics.
    img_bf = jnp.tanh(weight[0].reshape(C * H, W)).astype(jnp.bfloat16)

    gxy = jnp.transpose(uv.reshape(N, 2).astype(jnp.float32), (1, 0))  # (2, N)
    if N_pad != N:
        gxy = jnp.pad(gxy, ((0, 0), (0, N_pad - N)))  # padded points sliced off later

    out = pl.pallas_call(
        _make_uv_sample_kernel(C, H, W),
        out_shape=jax.ShapeDtypeStruct((C, N_pad), jnp.float32),
        grid=(N_pad // TN,),
        in_specs=[
            # resident image: constant block index -> DMA'd once, reused.
            pl.BlockSpec((C * H, W), lambda i: (0, 0)),
            pl.BlockSpec((2, TN), lambda i: (0, i)),
        ],
        out_specs=pl.BlockSpec((C, TN), lambda i: (0, i)),
        compiler_params=pltpu.CompilerParams(
            dimension_semantics=("parallel",)),
    )(img_bf, gxy)

    out = out[:, :N]                                                  # (3, N)
    # texture.view(1, 3, f, t, t).permute(0, 2, 3, 4, 1) -> (1, f, t, t, 3)
    return jnp.transpose(out, (1, 0)).reshape(1, f, t, t, C)


def _reference_forward(weight, uv):
    """Pure-JAX f32 reference of the same grid_sample semantics (verification)."""
    _, C, H, W = weight.shape
    f, t = uv.shape[0], uv.shape[1]
    img = jnp.tanh(weight[0])                                         # (3, H, W)
    g = uv.reshape(-1, 2)
    ix = ((g[:, 0] + 1.0) * W - 1.0) * 0.5
    iy = ((g[:, 1] + 1.0) * H - 1.0) * 0.5
    ix0 = jnp.floor(ix)
    iy0 = jnp.floor(iy)
    wx1 = ix - ix0
    wy1 = iy - iy0

    def fetch(iyc, ixc):
        valid = (ixc >= 0) & (ixc < W) & (iyc >= 0) & (iyc < H)
        iyc_c = jnp.clip(iyc, 0, H - 1).astype(jnp.int32)
        ixc_c = jnp.clip(ixc, 0, W - 1).astype(jnp.int32)
        vals = img[:, iyc_c, ixc_c]                                   # (3, N)
        return vals * valid.astype(jnp.float32)[None, :]

    out = (
        fetch(iy0, ix0) * ((1 - wy1) * (1 - wx1))[None, :]
        + fetch(iy0, ix0 + 1) * ((1 - wy1) * wx1)[None, :]
        + fetch(iy0 + 1, ix0) * (wy1 * (1 - wx1))[None, :]
        + fetch(iy0 + 1, ix0 + 1) * (wy1 * wx1)[None, :]
    )                                                                 # (3, N)
    return out.T.reshape(1, f, t, t, C)


if __name__ == "__main__":
    key = jax.random.PRNGKey(0)
    k_w, k_uv = jax.random.split(key)

    image_size = 16   # S  -> H = W = 16
    f, t = 6, 8       # N = f*t*t = 384 sample points -> padded to 512, grid = (2,)

    # Parameter per __init__ is zeros - 1.0; add a small deterministic
    # perturbation so bilinear interpolation is actually exercised.
    weight = (
        -1.0 + 0.5 * jax.random.normal(k_w, (1, 3, image_size, image_size))
    ).astype(jnp.float32)
    # Coords slightly outside [-1, 1] to exercise zeros padding.
    uv = jax.random.uniform(
        k_uv, (f, t, t, 2), minval=-1.2, maxval=1.2, dtype=jnp.float32
    )

    texture = jax.block_until_ready(uv_image_model_forward(weight, uv))
    ref = _reference_forward(weight, uv)

    assert texture.shape == (1, f, t, t, 3), texture.shape
    # bf16 image + bf16 x-weights on the MXU (values bounded by 1) -> ~4e-3.
    max_err = float(jnp.max(jnp.abs(texture - ref)))
    assert max_err < 1e-2, f"mismatch vs reference: max abs err {max_err}"

    print("KERNEL_OK")
</pallas_src>

<mosaic_0001>
module attributes {stable_mosaic.version = 11 : i64} {
  func.func @kernel(%arg0: i32, %arg1: memref<48x16xbf16, #tpu.memory_space<vmem>>, %arg2: memref<2x256xf32, #tpu.memory_space<vmem>>, %arg3: memref<3x256xf32, #tpu.memory_space<vmem>>) attributes {dimension_semantics = [#tpu.dimension_semantics<parallel>], iteration_bounds = array<i64: 2>, scalar_prefetch = 0 : i64, scratch_operands = 0 : i64, tpu.core_type = #tpu.core_type<tc>, window_params = [{pipeline_mode = #tpu.pipeline_mode<synchronous>, transform_indices = @transform_0, window_bounds = array<i64: 48, 16>}, {transform_indices = @transform_1, window_bounds = array<i64: 2, 256>}, {transform_indices = @transform_2, window_bounds = array<i64: 3, 256>}]} {
    %c0 = arith.constant 0 : index
    %c0_0 = arith.constant 0 : index
    %0 = vector.load %arg2[%c0, %c0_0] : memref<2x256xf32, #tpu.memory_space<vmem>>, vector<1x256xf32>
    %c1 = arith.constant 1 : index
    %c0_1 = arith.constant 0 : index
    %1 = vector.load %arg2[%c1, %c0_1] : memref<2x256xf32, #tpu.memory_space<vmem>>, vector<1x256xf32>
    %cst = arith.constant 1.000000e+00 : f32
    %2 = vector.broadcast %cst : f32 to vector<1x256xf32>
    %3 = arith.addf %0, %2 : vector<1x256xf32>
    %cst_2 = arith.constant 1.600000e+01 : f32
    %4 = vector.broadcast %cst_2 : f32 to vector<1x256xf32>
    %5 = arith.mulf %3, %4 : vector<1x256xf32>
    %cst_3 = arith.constant 1.000000e+00 : f32
    %6 = vector.broadcast %cst_3 : f32 to vector<1x256xf32>
    %7 = arith.subf %5, %6 : vector<1x256xf32>
    %cst_4 = arith.constant 5.000000e-01 : f32
    %8 = vector.broadcast %cst_4 : f32 to vector<1x256xf32>
    %9 = arith.mulf %7, %8 : vector<1x256xf32>
    %cst_5 = arith.constant 1.000000e+00 : f32
    %10 = vector.broadcast %cst_5 : f32 to vector<1x256xf32>
    %11 = arith.addf %1, %10 : vector<1x256xf32>
    %cst_6 = arith.constant 1.600000e+01 : f32
    %12 = vector.broadcast %cst_6 : f32 to vector<1x256xf32>
    %13 = arith.mulf %11, %12 : vector<1x256xf32>
    %cst_7 = arith.constant 1.000000e+00 : f32
    %14 = vector.broadcast %cst_7 : f32 to vector<1x256xf32>
    %15 = arith.subf %13, %14 : vector<1x256xf32>
    %cst_8 = arith.constant 5.000000e-01 : f32
    %16 = vector.broadcast %cst_8 : f32 to vector<1x256xf32>
    %17 = arith.mulf %15, %16 : vector<1x256xf32>
    %18 = math.floor %9 : vector<1x256xf32>
    %19 = math.floor %17 : vector<1x256xf32>
    %20 = arith.subf %9, %18 : vector<1x256xf32>
    %cst_9 = arith.constant 1.000000e+00 : f32
    %21 = vector.broadcast %cst_9 : f32 to vector<1x256xf32>
    %22 = arith.subf %21, %20 : vector<1x256xf32>
    %23 = arith.subf %17, %19 : vector<1x256xf32>
    %cst_10 = arith.constant 1.000000e+00 : f32
    %24 = vector.broadcast %cst_10 : f32 to vector<1x256xf32>
    %25 = arith.subf %24, %23 : vector<1x256xf32>
    %26 = arith.fptosi %18 : vector<1x256xf32> to vector<1x256xi32>
    %27 = arith.fptosi %19 : vector<1x256xf32> to vector<1x256xi32>
    %c1_i32 = arith.constant 1 : i32
    %28 = vector.broadcast %c1_i32 : i32 to vector<1x256xi32>
    %29 = arith.addi %26, %28 : vector<1x256xi32>
    %c1_i32_11 = arith.constant 1 : i32
    %30 = vector.broadcast %c1_i32_11 : i32 to vector<1x256xi32>
    %31 = arith.addi %27, %30 : vector<1x256xi32>
    %c0_i32 = arith.constant 0 : i32
    %32 = vector.broadcast %c0_i32 : i32 to vector<1x256xi32>
    %33 = arith.cmpi sge, %26, %32 : vector<1x256xi32>
    %c16_i32 = arith.constant 16 : i32
    %34 = vector.broadcast %c16_i32 : i32 to vector<1x256xi32>
    %35 = arith.cmpi slt, %26, %34 : vector<1x256xi32>
    %36 = arith.andi %33, %35 : vector<1x256xi1>
    %cst_12 = arith.constant 0.000000e+00 : f32
    %37 = vector.broadcast %cst_12 : f32 to vector<1x256xf32>
    %38 = arith.select %36, %22, %37 : vector<1x256xi1>, vector<1x256xf32>
    %c0_i32_13 = arith.constant 0 : i32
    %39 = vector.broadcast %c0_i32_13 : i32 to vector<1x256xi32>
    %40 = arith.cmpi sge, %29, %39 : vector<1x256xi32>
    %c16_i32_14 = arith.constant 16 : i32
    %41 = vector.broadcast %c16_i32_14 : i32 to vector<1x256xi32>
    %42 = arith.cmpi slt, %29, %41 : vector<1x256xi32>
    %43 = arith.andi %40, %42 : vector<1x256xi1>
    %cst_15 = arith.constant 0.000000e+00 : f32
    %44 = vector.broadcast %cst_15 : f32 to vector<1x256xf32>
    %45 = arith.select %43, %20, %44 : vector<1x256xi1>, vector<1x256xf32>
    %c0_i32_16 = arith.constant 0 : i32
    %46 = vector.broadcast %c0_i32_16 : i32 to vector<1x256xi32>
    %47 = arith.cmpi sge, %27, %46 : vector<1x256xi32>
    %c16_i32_17 = arith.constant 16 : i32
    %48 = vector.broadcast %c16_i32_17 : i32 to vector<1x256xi32>
    %49 = arith.cmpi slt, %27, %48 : vector<1x256xi32>
    %50 = arith.andi %47, %49 : vector<1x256xi1>
    %cst_18 = arith.constant 0.000000e+00 : f32
    %51 = vector.broadcast %cst_18 : f32 to vector<1x256xf32>
    %52 = arith.select %50, %25, %51 : vector<1x256xi1>, vector<1x256xf32>
    %c0_i32_19 = arith.constant 0 : i32
    %53 = vector.broadcast %c0_i32_19 : i32 to vector<1x256xi32>
    %54 = arith.cmpi sge, %31, %53 : vector<1x256xi32>
    %c16_i32_20 = arith.constant 16 : i32
    %55 = vector.broadcast %c16_i32_20 : i32 to vector<1x256xi32>
    %56 = arith.cmpi slt, %31, %55 : vector<1x256xi32>
    %57 = arith.andi %54, %56 : vector<1x256xi1>
    %cst_21 = arith.constant 0.000000e+00 : f32
    %58 = vector.broadcast %cst_21 : f32 to vector<1x256xf32>
    %59 = arith.select %57, %23, %58 : vector<1x256xi1>, vector<1x256xf32>
    %60 = tpu.iota {dimensions = array<i32: 0>} : vector<16x1xi32>
    %61 = tpu.iota {dimensions = array<i32: 0>} : vector<16x1xi32>
    %62 = vector.broadcast %60 : vector<16x1xi32> to vector<16x256xi32>
    %63 = vector.broadcast %26 : vector<1x256xi32> to vector<16x256xi32>
    %64 = arith.cmpi eq, %62, %63 : vector<16x256xi32>
    %cst_22 = arith.constant 0.000000e+00 : f32
    %65 = vector.shape_cast %38 : vector<1x256xf32> to vector<1x256xf32>
    %66 = vector.broadcast %65 : vector<1x256xf32> to vector<16x256xf32>
    %67 = vector.broadcast %cst_22 : f32 to vector<16x256xf32>
    %68 = arith.select %64, %66, %67 : vector<16x256xi1>, vector<16x256xf32>
    %69 = vector.broadcast %60 : vector<16x1xi32> to vector<16x256xi32>
    %70 = vector.broadcast %29 : vector<1x256xi32> to vector<16x256xi32>
    %71 = arith.cmpi eq, %69, %70 : vector<16x256xi32>
    %cst_23 = arith.constant 0.000000e+00 : f32
    %72 = vector.shape_cast %45 : vector<1x256xf32> to vector<1x256xf32>
    %73 = vector.broadcast %72 : vector<1x256xf32> to vector<16x256xf32>
    %74 = vector.broadcast %cst_23 : f32 to vector<16x256xf32>
    %75 = arith.select %71, %73, %74 : vector<16x256xi1>, vector<16x256xf32>
    %76 = arith.addf %68, %75 : vector<16x256xf32>
    %77 = vector.broadcast %61 : vector<16x1xi32> to vector<16x256xi32>
    %78 = vector.broadcast %27 : vector<1x256xi32> to vector<16x256xi32>
    %79 = arith.cmpi eq, %77, %78 : vector<16x256xi32>
    %cst_24 = arith.constant 0.000000e+00 : f32
    %80 = vector.shape_cast %52 : vector<1x256xf32> to vector<1x256xf32>
    %81 = vector.broadcast %80 : vector<1x256xf32> to vector<16x256xf32>
    %82 = vector.broadcast %cst_24 : f32 to vector<16x256xf32>
    %83 = arith.select %79, %81, %82 : vector<16x256xi1>, vector<16x256xf32>
    %84 = vector.broadcast %61 : vector<16x1xi32> to vector<16x256xi32>
    %85 = vector.broadcast %31 : vector<1x256xi32> to vector<16x256xi32>
    %86 = arith.cmpi eq, %84, %85 : vector<16x256xi32>
    %cst_25 = arith.constant 0.000000e+00 : f32
    %87 = vector.shape_cast %59 : vector<1x256xf32> to vector<1x256xf32>
    %88 = vector.broadcast %87 : vector<1x256xf32> to vector<16x256xf32>
    %89 = vector.broadcast %cst_25 : f32 to vector<16x256xf32>
    %90 = arith.select %86, %88, %89 : vector<16x256xi1>, vector<16x256xf32>
    %91 = arith.addf %83, %90 : vector<16x256xf32>
    %c0_26 = arith.constant 0 : index
    %c0_27 = arith.constant 0 : index
    %92 = vector.load %arg1[%c0_26, %c0_27] : memref<48x16xbf16, #tpu.memory_space<vmem>>, vector<48x16xbf16>
    %93 = arith.truncf %76 : vector<16x256xf32> to vector<16x256xbf16>
    %cst_28 = arith.constant dense<0.000000e+00> : vector<48x256xf32>
    %94 = tpu.matmul %92, %93, %cst_28 {dimension_numbers = #tpu.dot_dimension_numbers<[1], [0], [0], [1], [0, 0, 1, 1], [], []>} : vector<48x16xbf16>, vector<16x256xbf16>, vector<48x256xf32> -> vector<48x256xf32>
    %95 = vector.shape_cast %94 : vector<48x256xf32> to vector<3x16x256xf32>
    %96 = vector.shape_cast %91 : vector<16x256xf32> to vector<1x16x256xf32>
    %97 = vector.broadcast %96 : vector<1x16x256xf32> to vector<3x16x256xf32>
    %98 = arith.mulf %95, %97 : vector<3x16x256xf32>
    %cst_29 = arith.constant dense<0.000000e+00> : vector<3x256xf32>
    %99 = vector.multi_reduction <add>, %98, %cst_29 [1] : vector<3x16x256xf32> to vector<3x256xf32>
    %c0_30 = arith.constant 0 : index
    %c0_31 = arith.constant 0 : index
    %100 = vector.load %arg3[%c0_30, %c0_31] : memref<3x256xf32, #tpu.memory_space<vmem>>, vector<3x256xf32>
    tpu.vector_store %arg3[%c0_30, %c0_31], %99 {strides = array<i32>} : memref<3x256xf32, #tpu.memory_space<vmem>>, vector<3x256xf32>,
    return
  }
  func.func @transform_0(%arg0: i32) -> (i32, i32) {
    %c0_i32 = arith.constant 0 : i32
    %c0_i32_0 = arith.constant 0 : i32
    %c0_i32_1 = arith.constant 0 : i32
    return %c0_i32, %c0_i32_0 : i32, i32
  }
  func.func @transform_1(%arg0: i32) -> (i32, i32) {
    %c0_i32 = arith.constant 0 : i32
    %c0_i32_0 = arith.constant 0 : i32
    return %c0_i32, %arg0 : i32, i32
  }
  func.func @transform_2(%arg0: i32) -> (i32, i32) {
    %c0_i32 = arith.constant 0 : i32
    %c0_i32_0 = arith.constant 0 : i32
    return %c0_i32, %arg0 : i32, i32
  }
}

</mosaic_0001>

<bundles_post_ra>
// kernel: uv_image_model_forward.1
= control target key start
LH: loop header
LB: loop body
LE: loop exit
PB: predicated region body
PF: predicated region fallthrough
CT: control target
= control target key end

     0   :  { %s593_s9 = smov 0   ;;  %s674_s0 = inlined_call_operand.vmem [shape: bf16[48,16], index: 0, kind: input, shape index: {}]   ;;  %s675_s1 = inlined_call_operand.vmem [shape: f32[2,512], index: 1, kind: input, shape index: {}]   ;;  %s676_s2 = inlined_call_operand.vmem [shape: f32[3,512], index: 2, kind: output, shape index: {}]  }
   0x1 LB: > { %s531_s10 = sadd.s32 4294967295, %s575_s9   ;;  %p535_p0 = scmp.ge.s32.totalorder %s575_s9, 1  ;;  %s575_s9 = sphi %s593_s9, %s12_s9  }
   0x2   : > { %p113_p1 = scmp.lt.s32.totalorder %s575_s9, 3 }
   0x4   : > { %p114_p2 = pnand %p535_p0, %p113_p1 }
   0x5   : > { %s536_s11 = sshll.u32 (!%p114_p2), %s531_s10, 1 }
   0x6   : > { %117 = sbr.rel (%p114_p2) target bundleno = 277 (0x115), region = 28  ;;  %p136_p3 = scmp.lt.s32.totalorder (!%p114_p2), %s536_s11, 3 }
   0xb   : > { %v577_v0 = vmov 0   ;;  %s678_s11 = smov (!%p136_p3, %s536_s11), 3  ;;  %v185_v5 = vlaneseq  ;;  %v566_v58 = vld [vmem:[%s674_s0] sm:$0xff]   ;;  %v567_v59 = vld [vmem:[%s674_s0 + $0x8] sm:$0xff]   ;;  %v568_v63 = vld [vmem:[%s674_s0 + $0x10] sm:$0xff]  }
   0xc   : > { %369 = vmatprep.mubr.bf16.mxu0 %v577_v0  ;;  %379 = vmatprep.mubr.bf16.mxu1 %v577_v0  ;;  %s537_s12 = sshll.u32 %s678_s11, 1  ;;  %s539_s22 = sshll.u32 %s678_s11, 2 }
   0xd   : > { %s139_s15 = scalar_lea.vmem %s675_s1, %s537_s12  ;;  %v609_v10 = vshrl.u32 %v185_v5, 7  ;;  %s145_s25 = scalar_lea.vmem %s676_s2, %s539_s22 }
   0xe   : > { %v148_v1 = vld [vmem:[%s139_s15] ss:$2 sm:$0x3]  ;;  %v540_v2 = vld [vmem:[%s139_s15 + $0x1] ss:$2 sm:$0x3] }
   0xf   : > { %v151_v3 = vadd.f32 1.0, %v148_v1  ;;  %v155_v4 = vadd.f32 1.0, %v540_v2  ;;  %v612_v15 = vsub.s32 1, %v609_v10  ;;  %v190_v20 = vsub.s32 0, %v609_v10 }
  0x10   : > { %v618_v24 = vadd.s32 8, %v609_v10 }
  0x11   : > { %v152_v6 = vmul.f32 16.0, %v151_v3  ;;  %v156_v7 = vmul.f32 16.0, %v155_v4 }
  0x13   : > { %v541_v8 = vadd.f32 -1.0, %v152_v6  ;;  %v542_v9 = vadd.f32 -1.0, %v156_v7 }
  0x15   : > { %v154_v11 = vmul.f32 0.5, %v541_v8  ;;  %v158_v12 = vmul.f32 0.5, %v542_v9 }
  0x17   : > { %v159_v13 = vfloor.f32 %v154_v11  ;;  %v160_v14 = vfloor.f32 %v158_v12 }
  0x19   : > { %v161_v16 = vsub.f32 %v154_v11, %v159_v13  ;;  %v553_v17 = vtrunc.f32 %v159_v13  ;;  %v163_v18 = vsub.f32 %v158_v12, %v160_v14  ;;  %v555_v19 = vtrunc.f32 %v160_v14 }
  0x1b   : > { %v162_v21 = vsub.f32 1.0, %v161_v16  ;;  %v554_v22 = vcvt.f32.s32 %v553_v17  ;;  %v615_v23 = vcvt.f32.s32 %v555_v19  ;;  %v164_v25 = vsub.f32 1.0, %v163_v18 }
  0x1d   : > { %v167_v26 = vadd.s32 1, %v554_v22  ;;  %vm169_vm0 = vcmp.ge.s32.totalorder %v554_v22, 0  ;;  %vm170_vm1 = vcmp.lt.s32.totalorder %v554_v22, 16  ;;  %v195_v27 = vrot.slane %v554_v22, %v612_v15 }
  0x1e   : > { %vm171_vm2 = vmand %vm169_vm0, %vm170_vm1  ;;  %v191_v28 = vrot.slane %v554_v22, %v190_v20  ;;  %v622_v29 = vadd.s32 1, %v615_v23  ;;  %vm177_vm3 = vcmp.ge.s32.totalorder %v615_v23, 0  ;;  %vm178_vm4 = vcmp.lt.s32.totalorder %v615_v23, 16 }
  0x1f   : > { %v172_v30 = vsel %vm171_vm2, %v162_v21, 0.0  ;;  %vm173_vm5 = vcmp.ge.s32.totalorder %v167_v26, 0  ;;  %vm174_vm6 = vcmp.lt.s32.totalorder %v167_v26, 16  ;;  %vm197_vm7 = vcmp.eq.s32.totalorder %v609_v10, %v195_v27  ;;  %vm179_vm12 = vmand %vm177_vm3, %vm178_vm4 }
  0x20   : > { %vm175_vm8 = vmand %vm173_vm5, %vm174_vm6  ;;  %vm199_vm9 = vcmp.eq.s32.totalorder %v618_v24, %v195_v27  ;;  %v208_v31 = vrot.slane %v172_v30, %v612_v15  ;;  %v222_v32 = vrot.slane %v167_v26, %v612_v15  ;;  %vm196_vm10 = vcmp.eq.s32.totalorder %v609_v10, %v191_v28 }
  0x21   : > { %v176_v33 = vsel %vm175_vm8, %v161_v16, 0.0  ;;  %vm198_vm11 = vcmp.eq.s32.totalorder %v618_v24, %v191_v28  ;;  %v204_v34 = vrot.slane %v172_v30, %v190_v20  ;;  %v218_v35 = vrot.slane %v167_v26, %v190_v20 }
  0x22   : > { %v212_v36 = vsel %vm197_vm7, %v208_v31, 0.0  ;;  %v214_v37 = vsel %vm199_vm9, %v208_v31, 0.0  ;;  %vm224_vm13 = vcmp.eq.s32.totalorder %v609_v10, %v222_v32  ;;  %vm226_vm14 = vcmp.eq.s32.totalorder %v618_v24, %v222_v32 }
  0x23   : > { %v235_v38 = vrot.slane %v176_v33, %v612_v15  ;;  %v211_v39 = vsel %vm196_vm10, %v204_v34, 0.0  ;;  %v213_v40 = vsel %vm198_vm11, %v204_v34, 0.0  ;;  %vm223_vm15 = vcmp.eq.s32.totalorder %v609_v10, %v218_v35 }
  0x24   : > { %vm225_vm0 = vcmp.eq.s32.totalorder %v618_v24, %v218_v35  ;;  %v231_v41 = vrot.slane %v176_v33, %v190_v20  ;;  %v180_v42 = vsel %vm179_vm12, %v164_v25, 0.0  ;;  %vm181_vm1 = vcmp.ge.s32.totalorder %v622_v29, 0 }
  0x25   : > { %v239_v43 = vsel %vm224_vm13, %v235_v38, 0.0  ;;  %v241_v44 = vsel %vm226_vm14, %v235_v38, 0.0  ;;  %vm182_vm2 = vcmp.lt.s32.totalorder %v622_v29, 16  ;;  %v249_v45 = vrot.slane %v615_v23, %v190_v20 }
  0x26   : > { %v243_v46 = vadd.f32 %v239_v43, %v212_v36  ;;  %v245_v47 = vadd.f32 %v241_v44, %v214_v37  ;;  %v238_v48 = vsel %vm223_vm15, %v231_v41, 0.0  ;;  %v240_v49 = vsel %vm225_vm0, %v231_v41, 0.0  ;;  %vm183_vm3 = vmand %vm181_vm1, %vm182_vm2 }
  0x27   : > { %v242_v50 = vadd.f32 %v238_v48, %v211_v39  ;;  %v244_v51 = vadd.f32 %v240_v49, %v213_v40  ;;  %v184_v52 = vsel %vm183_vm3, %v163_v18, 0.0  ;;  %vm254_vm4 = vcmp.eq.s32.totalorder %v609_v10, %v249_v45 }
  0x28   : > { %v311_v53 = vpack.c.bf16 %v245_v47, %v243_v46  ;;  %v262_v54 = vrot.slane %v180_v42, %v190_v20  ;;  %v276_v55 = vrot.slane %v622_v29, %v190_v20  ;;  %v289_v56 = vrot.slane %v184_v52, %v190_v20 }
  0x29   : > { %v310_v57 = vpack.c.bf16 %v244_v51, %v242_v50  ;;  %vm327_vm6 = vcmask 130048   ;;  %vm256_vm7 = vcmp.eq.s32.totalorder %v618_v24, %v249_v45  ;;  %v253_v4 = vrot.slane %v615_v23, %v612_v15 }
  0x2a   : > { %351 = vmatprep.subr.bf16.mxu0 %v311_v53  ;;  %551 = vmatprep.subr.bf16.mxu1 %v311_v53  ;;  %v269_v60 = vsel %vm254_vm4, %v262_v54, 0.0  ;;  %vm281_vm5 = vcmp.eq.s32.totalorder %v609_v10, %v276_v55  ;;  %vm283_vm8 = vcmp.eq.s32.totalorder %v618_v24, %v276_v55  ;;  %v271_v1 = vsel %vm256_vm7, %v262_v54, 0.0 }
  0x2b   : > { %352 = vmatpush1.bf16.msra.mxu0 %v310_v57  ;;  %552 = vmatpush1.bf16.msra.mxu1 %v310_v57  ;;  %v296_v61 = vsel %vm281_vm5, %v289_v56, 0.0  ;;  %v298_v2 = vsel %vm283_vm8, %v289_v56, 0.0  ;;  %v280_v5 = vrot.slane %v622_v29, %v612_v15  ;;  %v293_v6 = vrot.slane %v184_v52, %v612_v15 }
  0x2c   : > { %v300_v62 = vadd.f32 %v296_v61, %v269_v60  ;;  %v302_v3 = vadd.f32 %v298_v2, %v271_v1  ;;  %vm255_vm9 = vcmp.eq.s32.totalorder %v609_v10, %v253_v4  ;;  %vm257_vm11 = vcmp.eq.s32.totalorder %v618_v24, %v253_v4 }
  0x2d   : > { %vm282_vm10 = vcmp.eq.s32.totalorder %v609_v10, %v280_v5  ;;  %vm284_vm12 = vcmp.eq.s32.totalorder %v618_v24, %v280_v5  ;;  %vm464_vm13 = vcmask 1041409   ;;  %vm466_vm14 = vcmask 1045509  }
  0x2e   : > { %546 = vmatmul.mubr.msk.bf16.vlgmr.msra.gmra.mxu0 %vm327_vm6, %v566_v58  ;;  %547 = vmatmul.mubr.msk.bf16.vlgmr.msra.gmra.mxu1 %vm327_vm6, %v567_v59  ;;  %v297_v8 = vsel %vm282_vm10, %v293_v6, 0.0  ;;  %v299_v13 = vsel %vm284_vm12, %v293_v6, 0.0  ;;  %vm469_vm15 = vcmask 1042434   ;;  %vm471_vm0 = vcmask 1046534  }
  0x2f   : > { %389 = vmatprep.mubr.bf16.mxu1 %v577_v0  ;;  %v266_v0 = vrot.slane %v180_v42, %v612_v15 }
  0x31   : > { %v270_v7 = vsel %vm255_vm9, %v266_v0, 0.0  ;;  %v272_v12 = vsel %vm257_vm11, %v266_v0, 0.0 }
  0x32   : > { %v301_v14 = vadd.f32 %v297_v8, %v270_v7  ;;  %v303_v19 = vadd.f32 %v299_v13, %v272_v12 }
  0x36   : > { %548 = vmatmul.mubr.msk.bf16.gmra.mxu1 %vm327_vm6, %v568_v63 }
  0xee   : > { %v371_v9 = vpop.f32.mrf.mxu0  ;;  %v381_v11 = vpop.f32.mrf.mxu1 }
  0xef   : > { %v400_v18 = vmul.f32 %v371_v9, %v300_v62  ;;  %v404_v21 = vmul.f32 %v381_v11, %v300_v62 }
  0xf0   : > { %v373_v16 = vpop.f32.mrf.mxu0  ;;  %v383_v17 = vpop.f32.mrf.mxu1 }
  0xf1   : > { %v401_v22 = vmul.f32 %v373_v16, %v301_v14  ;;  %v405_v25 = vmul.f32 %v383_v17, %v301_v14 }
  0xf2   : > { %v375_v15 = vpop.f32.mrf.mxu0  ;;  %v385_v20 = vpop.f32.mrf.mxu1 }
  0xf3   : > { %v402_v10 = vmul.f32 %v375_v15, %v302_v3  ;;  %v406_v23 = vmul.f32 %v385_v20, %v302_v3 }
  0xf4   : > { %v377_v26 = vpop.f32.mrf.mxu0  ;;  %v387_v24 = vpop.f32.mrf.mxu1 }
  0xf5   : > { %v412_v27 = vadd.f32 %v402_v10, %v400_v18  ;;  %v426_v28 = vadd.f32 %v406_v23, %v404_v21  ;;  %v403_v29 = vmul.f32 %v377_v26, %v303_v19  ;;  %v407_v30 = vmul.f32 %v387_v24, %v303_v19 }
  0xf6   : > { %v391_v31 = vpop.f32.mrf.mxu1 }
  0xf7   : > { %v413_v32 = vrot.slane %v412_v27, 4  ;;  %v427_v33 = vrot.slane %v426_v28, 4  ;;  %v419_v34 = vadd.f32 %v403_v29, %v401_v22  ;;  %v433_v35 = vadd.f32 %v407_v30, %v405_v25 }
  0xf8   : > { %v393_v36 = vpop.f32.mrf.mxu1  ;;  %v408_v46 = vmul.f32 %v391_v31, %v300_v62 }
  0xf9   : > { %v414_v37 = vadd.f32 %v413_v32, %v412_v27  ;;  %v428_v38 = vadd.f32 %v427_v33, %v426_v28  ;;  %v420_v39 = vrot.slane %v419_v34, 4  ;;  %v434_v40 = vrot.slane %v433_v35, 4 }
  0xfa   : > { %v395_v41 = vpop.f32.mrf.mxu1  ;;  %v409_v53 = vmul.f32 %v393_v36, %v301_v14 }
  0xfb   : > { %v415_v42 = vrot.slane %v414_v37, 2  ;;  %v429_v43 = vrot.slane %v428_v38, 2  ;;  %v421_v44 = vadd.f32 %v420_v39, %v419_v34  ;;  %v435_v45 = vadd.f32 %v434_v40, %v433_v35 }
  0xfc   : > { %v410_v47 = vmul.f32 %v395_v41, %v302_v3  ;;  %v397_v48 = vpop.f32.mrf.mxu1 }
  0xfd   : > { %v416_v49 = vadd.f32 %v415_v42, %v414_v37  ;;  %v430_v50 = vadd.f32 %v429_v43, %v428_v38  ;;  %v422_v51 = vrot.slane %v421_v44, 2  ;;  %v436_v52 = vrot.slane %v435_v45, 2 }
  0xfe   : > { %v440_v54 = vadd.f32 %v410_v47, %v408_v46  ;;  %v411_v55 = vmul.f32 %v397_v48, %v303_v19 }
  0xff   : > { %v417_v56 = vrot.slane %v416_v49, 1  ;;  %v431_v57 = vrot.slane %v430_v50, 1  ;;  %v423_v58 = vadd.f32 %v422_v51, %v421_v44  ;;  %v437_v59 = vadd.f32 %v436_v52, %v435_v45 }
 0x100   : > { %v441_v60 = vrot.slane %v440_v54, 4  ;;  %v447_v61 = vadd.f32 %v411_v55, %v409_v53 }
 0x101   : > { %v424_v63 = vrot.slane %v423_v58, 1  ;;  %v438_v1 = vrot.slane %v437_v59, 1  ;;  %v418_v62 = vadd.f32 %v417_v56, %v416_v49  ;;  %v432_v3 = vadd.f32 %v431_v57, %v430_v50 }
 0x102   : > { %v442_v2 = vadd.f32 %v441_v60, %v440_v54  ;;  %v448_v4 = vrot.slane %v447_v61, 4 }
 0x103   : > { %v425_v5 = vadd.f32 %v424_v63, %v423_v58  ;;  %v439_v0 = vadd.f32 %v438_v1, %v437_v59 }
 0x104   : > { %v443_v6 = vrot.slane %v442_v2, 2  ;;  %v449_v7 = vadd.f32 %v448_v4, %v447_v61 }
 0x105   : > { %v460_v8 = vcombine.low %v418_v62, %v425_v5  ;;  %v461_v9 = vcombine.low %v432_v3, %v439_v0 }
 0x106   : > { %v444_v11 = vadd.f32 %v443_v6, %v442_v2  ;;  %v450_v12 = vrot.slane %v449_v7, 2 }
 0x107   : > { %v463_v13 = vrot.slane %v461_v9, 7 }
 0x108   : > { %v445_v14 = vrot.slane %v444_v11, 1  ;;  %v451_v16 = vadd.f32 %v450_v12, %v449_v7 }
 0x109   : > { %v465_v17 = vsel %vm464_vm13, %v463_v13, %v460_v8 }
 0x10a   : > { %v467_v18 = vsel %vm466_vm14, %v463_v13, %v465_v17  ;;  %v452_v19 = vrot.slane %v451_v16, 1  ;;  %v446_v15 = vadd.f32 %v445_v14, %v444_v11 }
 0x10c   : > { %v453_v20 = vadd.f32 %v452_v19, %v451_v16 }
 0x10e   : > { %v462_v21 = vcombine.low %v446_v15, %v453_v20 }
 0x110   : > { %v468_v22 = vrot.slane %v462_v21, 6 }
 0x112   : > { %v470_v10 = vsel %vm469_vm15, %v468_v22, %v467_v18 }
 0x113   : > { %v472_v23 = vsel %vm471_vm0, %v468_v22, %v470_v10 }
 0x114   : > { %474 = vst [vmem:[%s145_s25] sm:$0x77] %v472_v23 }
 0x115 PF: > { %s12_s9 = sadd.s32 1, %s575_s9  }
 0x116   : > { %p9_p4 = scmp.ge.s32.totalorder %s12_s9, 4  }
 0x118   :  { %11 = sbr.rel (!%p9_p4) target bundleno = 1 (0x1), region = 59 }

</bundles_post_ra>
